<compile_context>
chip_gen: v6e
topology: v6e:2x2x1
jax: 0.10.0
libtpu: 0.0.40
codegen_flags: <defaults>
</compile_context>

<pallas_src>
import functools

import jax
import jax.numpy as jnp
from jax.experimental import pallas as pl
from jax.experimental.pallas import tpu as pltpu


def _mlp_kernel(x_ref, w1_ref, b1_ref, w2_ref, b2_ref, w3_ref, b3_ref, o_ref):
    # x_ref : [in_dim, TILE_B] (f32 or bf16)   w*_ref : [out, in]   b*_ref : [out, 1]
    x = x_ref[...].astype(jnp.float32)          # matches x.float() in the module

    dot = functools.partial(
        jnp.dot,
        preferred_element_type=jnp.float32,
        precision=jax.lax.Precision.HIGHEST,    # exact-f32 parity with reference
    )

    h1 = jnp.maximum(dot(w1_ref[...], x) + b1_ref[...], 0.0)    # [8, TILE_B]
    h2 = jnp.maximum(dot(w2_ref[...], h1) + b2_ref[...], 0.0)   # [4, TILE_B]
    h3 = jnp.maximum(dot(w3_ref[...], h2) + b3_ref[...], 0.0)   # [1, TILE_B]

    o_ref[...] = h3.astype(o_ref.dtype)


def _cdiv(a, b):
    return -(-a // b)


def _round_up(n, m):
    return _cdiv(n, m) * m


def _choose_tile(batch, tile_b_max):
    """Pick a 128-aligned, tail-balanced batch tile; keep grid >= 2 when possible."""
    b128 = _round_up(max(int(batch), 1), 128)
    tile_b_max = max(_round_up(int(tile_b_max), 128), 128)
    n_steps = _cdiv(b128, tile_b_max)
    if b128 >= 256:
        n_steps = max(n_steps, 2)            # let v7x shard tiles across both TCs
    tb = _round_up(_cdiv(b128, n_steps), 128)
    b_pad = _round_up(b128, tb)
    return tb, b_pad


def mlp_forward(x, params, *, tile_b_max=65536, feature_major=False):
    """Forward pass of the MLP.

    x: [B, in_dim] (batch-major, default) or [in_dim, B] (feature_major=True),
       any float dtype.  Returns [B, out_dim] float32 (same semantics as
       MLP.forward, which casts to float first).
    """
    w1, b1 = params["w1"], params["b1"]
    w2, b2 = params["w2"], params["b2"]
    w3, b3 = params["w3"], params["b3"]

    if feature_major:
        in_dim, B = x.shape
    else:
        B, in_dim = x.shape
    out_dim = w3.shape[1]

    tb, b_pad = _choose_tile(B, tile_b_max)
    grid = (b_pad // tb,)

    # DMA x in its native narrow dtype when it is bf16 (halves dominant input
    # bytes); cast to f32 inside the kernel.  Everything else goes in as f32.
    x_dtype = x.dtype if x.dtype in (jnp.bfloat16, jnp.float32) else jnp.float32

    if feature_major and b_pad == B and x.dtype == x_dtype:
        x_t = x                                               # zero-copy path
    else:
        src = x if feature_major else x.T
        x_t = jnp.zeros((in_dim, b_pad), x_dtype).at[:, :B].set(src.astype(x_dtype))

    w1t = w1.T.astype(jnp.float32)                            # [out, in]
    w2t = w2.T.astype(jnp.float32)
    w3t = w3.T.astype(jnp.float32)
    b1c = b1.reshape(-1, 1).astype(jnp.float32)               # [out, 1]
    b2c = b2.reshape(-1, 1).astype(jnp.float32)
    b3c = b3.reshape(-1, 1).astype(jnp.float32)

    # VMEM budget: double-buffered x tile + double-buffered (sublane-padded)
    # output tile dominate; weights/biases are negligible.
    x_bytes = jnp.dtype(x_dtype).itemsize
    vmem_est = tb * (2 * in_dim * x_bytes + 2 * max(out_dim, 8) * 4) + (64 << 10)
    cp_kwargs = dict(
        dimension_semantics=("parallel",),                    # shard batch tiles
        allow_input_fusion=[True] + [False] * 6,              # fuse x pad/cast/T
    )
    if vmem_est > (12 << 20):
        cp_kwargs["vmem_limit_bytes"] = min(int(vmem_est * 1.5), 56 << 20)

    batch_spec = lambda rows: pl.BlockSpec((rows, tb), lambda i: (0, i))
    const_spec = lambda shape: pl.BlockSpec(shape, lambda i: (0, 0))

    out_t = pl.pallas_call(
        _mlp_kernel,
        out_shape=jax.ShapeDtypeStruct((out_dim, b_pad), jnp.float32),
        grid=grid,
        in_specs=[
            batch_spec(in_dim),                               # x: pipelined over batch
            const_spec(w1t.shape), const_spec(b1c.shape),     # VMEM-resident weights
            const_spec(w2t.shape), const_spec(b2c.shape),
            const_spec(w3t.shape), const_spec(b3c.shape),
        ],
        out_specs=batch_spec(out_dim),                        # lane-dense output store
        compiler_params=pltpu.CompilerParams(**cp_kwargs),
    )(x_t, w1t, b1c, w2t, b2c, w3t, b3c)

    return out_t[:, :B].T                                     # [B, out_dim]


def init_params(key, in_dim=6, out_dim=1):
    """Deterministic init mimicking nn.Linear default U(-1/sqrt(fan_in), +)."""
    dims = [(in_dim, 8), (8, 4), (4, out_dim)]
    params = {}
    for i, (fi, fo) in enumerate(dims, start=1):
        key, kw, kb = jax.random.split(key, 3)
        bound = 1.0 / jnp.sqrt(float(fi))
        params[f"w{i}"] = jax.random.uniform(kw, (fi, fo), jnp.float32,
                                             minval=-bound, maxval=bound)
        params[f"b{i}"] = jax.random.uniform(kb, (fo,), jnp.float32,
                                             minval=-bound, maxval=bound)
    return params


def mlp_reference(x, params):
    """Pure-JAX reference of the same forward pass (f32, exact precision)."""
    h = x.astype(jnp.float32)
    for i in (1, 2, 3):
        h = jnp.maximum(
            jnp.dot(h, params[f"w{i}"], precision=jax.lax.Precision.HIGHEST)
            + params[f"b{i}"], 0.0)
    return h


if __name__ == "__main__":
    key = jax.random.PRNGKey(0)
    kp, kx1, kx2, kx3 = jax.random.split(key, 4)

    in_dim, out_dim = 6, 1
    params = init_params(kp, in_dim=in_dim, out_dim=out_dim)

    # 1) Small batch (module-scale toy size): single grid step.
    x_small = jax.random.normal(kx1, (8, in_dim), dtype=jnp.float32)
    out_small = jax.block_until_ready(mlp_forward(x_small, params))
    ref_small = mlp_reference(x_small, params)
    assert out_small.shape == (8, out_dim), out_small.shape
    assert jnp.allclose(out_small, ref_small, atol=1e-5, rtol=1e-5)

    # 2) Non-multiple batch with a small tile cap: 3-step grid, tail columns
    #    balanced/padded and sliced off at the end.
    x_multi = jax.random.normal(kx2, (300, in_dim), dtype=jnp.float32)
    out_multi = jax.block_until_ready(mlp_forward(x_multi, params, tile_b_max=128))
    ref_multi = mlp_reference(x_multi, params)
    assert out_multi.shape == (300, out_dim), out_multi.shape
    assert jnp.allclose(out_multi, ref_multi, atol=1e-5, rtol=1e-5)

    # 3) bf16 input path: DMA'd as bf16, cast to f32 in-kernel (x.float()).
    x_bf16 = jax.random.normal(kx3, (64, in_dim), dtype=jnp.float32).astype(jnp.bfloat16)
    out_bf16 = jax.block_until_ready(mlp_forward(x_bf16, params))
    ref_bf16 = mlp_reference(x_bf16, params)
    assert out_bf16.shape == (64, out_dim), out_bf16.shape
    assert jnp.allclose(out_bf16, ref_bf16, atol=1e-5, rtol=1e-5)

    # 4) Feature-major producer path (no wrapper-side transpose materialization
    #    when the batch is already 128-aligned).
    x_fm = jnp.zeros((in_dim, 128), jnp.float32).at[:, :8].set(x_small.T)
    out_fm = jax.block_until_ready(mlp_forward(x_fm, params, feature_major=True))
    assert out_fm.shape == (128, out_dim), out_fm.shape
    assert jnp.allclose(out_fm[:8], ref_small, atol=1e-5, rtol=1e-5)

    # TODO(synk): the module's `self.text = x` attribute caching is Python-side
    # state with no kernel equivalent; the kernel only returns the output.
    print("KERNEL_OK")
</pallas_src>

<mosaic_0001>
module attributes {stable_mosaic.version = 11 : i64} {
  func.func @_mlp_kernel(%arg0: i32, %arg1: memref<6x128xf32, #tpu.memory_space<vmem>>, %arg2: memref<8x6xf32, #tpu.memory_space<vmem>>, %arg3: memref<8x1xf32, #tpu.memory_space<vmem>>, %arg4: memref<4x8xf32, #tpu.memory_space<vmem>>, %arg5: memref<4x1xf32, #tpu.memory_space<vmem>>, %arg6: memref<1x4xf32, #tpu.memory_space<vmem>>, %arg7: memref<1x1xf32, #tpu.memory_space<vmem>>, %arg8: memref<1x128xf32, #tpu.memory_space<vmem>>) attributes {dimension_semantics = [#tpu.dimension_semantics<parallel>], iteration_bounds = array<i64: 1>, scalar_prefetch = 0 : i64, scratch_operands = 0 : i64, tpu.core_type = #tpu.core_type<tc>, window_params = [{transform_indices = @transform_0, window_bounds = array<i64: 6, 128>}, {pipeline_mode = #tpu.pipeline_mode<synchronous>, transform_indices = @transform_1, window_bounds = array<i64: 8, 6>}, {pipeline_mode = #tpu.pipeline_mode<synchronous>, transform_indices = @transform_2, window_bounds = array<i64: 8, 1>}, {pipeline_mode = #tpu.pipeline_mode<synchronous>, transform_indices = @transform_3, window_bounds = array<i64: 4, 8>}, {pipeline_mode = #tpu.pipeline_mode<synchronous>, transform_indices = @transform_4, window_bounds = array<i64: 4, 1>}, {pipeline_mode = #tpu.pipeline_mode<synchronous>, transform_indices = @transform_5, window_bounds = array<i64: 1, 4>}, {pipeline_mode = #tpu.pipeline_mode<synchronous>, transform_indices = @transform_6, window_bounds = array<i64: 1, 1>}, {transform_indices = @transform_7, window_bounds = array<i64: 1, 128>}]} {
    %c0 = arith.constant 0 : index
    %c0_0 = arith.constant 0 : index
    %0 = vector.load %arg1[%c0, %c0_0] : memref<6x128xf32, #tpu.memory_space<vmem>>, vector<6x128xf32>
    %c0_1 = arith.constant 0 : index
    %c0_2 = arith.constant 0 : index
    %1 = vector.load %arg2[%c0_1, %c0_2] : memref<8x6xf32, #tpu.memory_space<vmem>>, vector<8x6xf32>
    %cst = arith.constant dense<0.000000e+00> : vector<8x128xf32>
    %2 = tpu.matmul %1, %0, %cst {dimension_numbers = #tpu.dot_dimension_numbers<[1], [0], [0], [1], [0, 0, 1, 1], [], []>, precision = #tpu.contract_precision<fp32>} : vector<8x6xf32>, vector<6x128xf32>, vector<8x128xf32> -> vector<8x128xf32>
    %c0_3 = arith.constant 0 : index
    %c0_4 = arith.constant 0 : index
    %3 = vector.load %arg3[%c0_3, %c0_4] : memref<8x1xf32, #tpu.memory_space<vmem>>, vector<8x1xf32>
    %4 = vector.broadcast %3 : vector<8x1xf32> to vector<8x128xf32>
    %5 = arith.addf %2, %4 : vector<8x128xf32>
    %cst_5 = arith.constant 0.000000e+00 : f32
    %6 = vector.broadcast %cst_5 : f32 to vector<8x128xf32>
    %7 = arith.maximumf %5, %6 : vector<8x128xf32>
    %c0_6 = arith.constant 0 : index
    %c0_7 = arith.constant 0 : index
    %8 = vector.load %arg4[%c0_6, %c0_7] : memref<4x8xf32, #tpu.memory_space<vmem>>, vector<4x8xf32>
    %cst_8 = arith.constant dense<0.000000e+00> : vector<4x128xf32>
    %9 = tpu.matmul %8, %7, %cst_8 {dimension_numbers = #tpu.dot_dimension_numbers<[1], [0], [0], [1], [0, 0, 1, 1], [], []>, precision = #tpu.contract_precision<fp32>} : vector<4x8xf32>, vector<8x128xf32>, vector<4x128xf32> -> vector<4x128xf32>
    %c0_9 = arith.constant 0 : index
    %c0_10 = arith.constant 0 : index
    %10 = vector.load %arg5[%c0_9, %c0_10] : memref<4x1xf32, #tpu.memory_space<vmem>>, vector<4x1xf32>
    %11 = vector.broadcast %10 : vector<4x1xf32> to vector<4x128xf32>
    %12 = arith.addf %9, %11 : vector<4x128xf32>
    %cst_11 = arith.constant 0.000000e+00 : f32
    %13 = vector.broadcast %cst_11 : f32 to vector<4x128xf32>
    %14 = arith.maximumf %12, %13 : vector<4x128xf32>
    %c0_12 = arith.constant 0 : index
    %c0_13 = arith.constant 0 : index
    %15 = vector.load %arg6[%c0_12, %c0_13] : memref<1x4xf32, #tpu.memory_space<vmem>>, vector<1x4xf32>
    %cst_14 = arith.constant dense<0.000000e+00> : vector<1x128xf32>
    %16 = tpu.matmul %15, %14, %cst_14 {dimension_numbers = #tpu.dot_dimension_numbers<[1], [0], [0], [1], [0, 0, 1, 1], [], []>, precision = #tpu.contract_precision<fp32>} : vector<1x4xf32>, vector<4x128xf32>, vector<1x128xf32> -> vector<1x128xf32>
    %c0_15 = arith.constant 0 : index
    %c0_16 = arith.constant 0 : index
    %17 = vector.load %arg7[%c0_15, %c0_16] : memref<1x1xf32, #tpu.memory_space<vmem>>, vector<1x1xf32>
    %18 = vector.broadcast %17 : vector<1x1xf32> to vector<1x128xf32>
    %19 = arith.addf %16, %18 : vector<1x128xf32>
    %cst_17 = arith.constant 0.000000e+00 : f32
    %20 = vector.broadcast %cst_17 : f32 to vector<1x128xf32>
    %21 = arith.maximumf %19, %20 : vector<1x128xf32>
    %c0_18 = arith.constant 0 : index
    %c0_19 = arith.constant 0 : index
    %22 = vector.load %arg8[%c0_18, %c0_19] : memref<1x128xf32, #tpu.memory_space<vmem>>, vector<1x128xf32>
    tpu.vector_store %arg8[%c0_18, %c0_19], %21 {strides = array<i32>} : memref<1x128xf32, #tpu.memory_space<vmem>>, vector<1x128xf32>,
    return
  }
  func.func @transform_0(%arg0: i32) -> (i32, i32) {
    %c0_i32 = arith.constant 0 : i32
    %c0_i32_0 = arith.constant 0 : i32
    return %c0_i32, %arg0 : i32, i32
  }
  func.func @transform_1(%arg0: i32) -> (i32, i32) {
    %c0_i32 = arith.constant 0 : i32
    %c0_i32_0 = arith.constant 0 : i32
    %c0_i32_1 = arith.constant 0 : i32
    return %c0_i32, %c0_i32_0 : i32, i32
  }
  func.func @transform_2(%arg0: i32) -> (i32, i32) {
    %c0_i32 = arith.constant 0 : i32
    %c0_i32_0 = arith.constant 0 : i32
    %c0_i32_1 = arith.constant 0 : i32
    return %c0_i32, %c0_i32_0 : i32, i32
  }
  func.func @transform_3(%arg0: i32) -> (i32, i32) {
    %c0_i32 = arith.constant 0 : i32
    %c0_i32_0 = arith.constant 0 : i32
    %c0_i32_1 = arith.constant 0 : i32
    return %c0_i32, %c0_i32_0 : i32, i32
  }
  func.func @transform_4(%arg0: i32) -> (i32, i32) {
    %c0_i32 = arith.constant 0 : i32
    %c0_i32_0 = arith.constant 0 : i32
    %c0_i32_1 = arith.constant 0 : i32
    return %c0_i32, %c0_i32_0 : i32, i32
  }
  func.func @transform_5(%arg0: i32) -> (i32, i32) {
    %c0_i32 = arith.constant 0 : i32
    %c0_i32_0 = arith.constant 0 : i32
    %c0_i32_1 = arith.constant 0 : i32
    return %c0_i32, %c0_i32_0 : i32, i32
  }
  func.func @transform_6(%arg0: i32) -> (i32, i32) {
    %c0_i32 = arith.constant 0 : i32
    %c0_i32_0 = arith.constant 0 : i32
    %c0_i32_1 = arith.constant 0 : i32
    return %c0_i32, %c0_i32_0 : i32, i32
  }
  func.func @transform_7(%arg0: i32) -> (i32, i32) {
    %c0_i32 = arith.constant 0 : i32
    %c0_i32_0 = arith.constant 0 : i32
    return %c0_i32, %arg0 : i32, i32
  }
}

</mosaic_0001>

<bundles_post_ra>
// kernel: tpu_custom_call.1
= control target key start
LH: loop header
LB: loop body
LE: loop exit
PB: predicated region body
PF: predicated region fallthrough
CT: control target
= control target key end

     0   :  { %s1707_s0 = inlined_call_operand.vmem [shape: f32[6,128], index: 0, kind: input, shape index: {}]   ;;  %s1708_s1 = inlined_call_operand.vmem [shape: f32[8,6], index: 1, kind: input, shape index: {}]   ;;  %s1709_s2 = inlined_call_operand.vmem [shape: f32[8,1], index: 2, kind: input, shape index: {}]   ;;  %s1710_s3 = inlined_call_operand.vmem [shape: f32[4,8], index: 3, kind: input, shape index: {}]   ;;  %s1711_s4 = inlined_call_operand.vmem [shape: f32[4,1], index: 4, kind: input, shape index: {}]   ;;  %s1712_s5 = inlined_call_operand.vmem [shape: f32[1,4], index: 5, kind: input, shape index: {}]   ;;  %s1713_s6 = inlined_call_operand.<no memory space> [shape: f32[1,1], index: 6, kind: input, shape index: {}]   ;;  %s1714_s7 = inlined_call_operand.hbm [shape: f32[1,128], index: 7, kind: output, shape index: {}]  }
   0x1   :  { %v12_v0 = vstv %s1713_s6 }
   0x2   :  { %13 = vst [vmem:[#allocation2] sm:$0x1] %v12_v0 }
   0x3   :  { %v29_v1 = vld [vmem:[%s1707_s0] sm:$0x3f]  ;;  %vm41_vm0 = vcmask 1045504   ;;  %v1585_v3 = vmov 0.0   ;;  %vm1586_vm1 = vmmov 0   ;;  %vm37_vm2 = vcmask 48128  }
   0x4   :  { %v30_v2 = vld [vmem:[%s1708_s1] sm:$0xff]  ;;  %1467 = vmatprep.subr.mxu0 %v1585_v3  ;;  %v43_v4 = vsel %vm41_vm0, %v29_v1, 0  ;;  %1469 = vmatprep.mubr.msk.f32.mxu0 %vm1586_vm1, %v1585_v3 }
   0x5   :  { %v31_v5 = vld [vmem:[%s1709_s2] sm:$0xff]  ;;  %v76_v6 = vand.u32 4294901760, %v43_v4  ;;  %1472 = vmatprep.subr.mxu1 %v1585_v3  ;;  %v39_v7 = vsel %vm37_vm2, %v30_v2, 0  ;;  %1474 = vmatprep.mubr.msk.f32.mxu1 %vm1586_vm1, %v1585_v3 }
   0x6   :  { %14 = vsyncpa [#allocation4], 0  ;;  %v111_v8 = vand.u32 4294901760, %v39_v7  ;;  %v1587_v9 = vmov 0   ;;  %v493_v12 = vld [vmem:[%s1711_s4] sm:$0xf] }
   0x7   :  { %1561 = vset.pattern.permute.xlu0 %v1587_v9  ;;  %1562 = vset.pattern.permute.xlu1 %v1587_v9  ;;  %v153_v10 = vsub.f32 %v43_v4, %v76_v6  ;;  %v492_v19 = vld [vmem:[%s1710_s3] sm:$0xf]  ;;  %vm499_vm3 = vcmask 64512   ;;  %vm961_vm4 = vcmask 31744   ;;  %vm965_vm5 = vcmask 1043456  }
   0x8   :  { %1468 = vmatpush3.msra.mxu0 %v76_v6  ;;  %34 = vperm.xlu0 %1561, %v31_v5   ;;  %v112_v11 = vsub.f32 %v39_v7, %v111_v8  ;;  %v501_v20 = vsel %vm499_vm3, %v492_v19, 0  ;;  %v950_v52 = vld [vmem:[%s1712_s5] sm:$0x1]  ;;  %s1588_s5 = smov [#allocation3]  }
   0x9   :  { %1477 = vmatprep.subr.mxu0 %v1585_v3  ;;  %v154_v13 = vand.u32 4294901760, %v153_v10  ;;  %v569_v21 = vand.u32 4294901760, %v501_v20  ;;  %v951_v51 = vld [vmem:[#allocation2] sm:$0x1]  ;;  %v963_v55 = vsel %vm961_vm4, %v950_v52, 0  ;;  %s1423_s9 = sshll.u32 %s1588_s5, 4  ;;  %s1424_s9 = int_to_ptr.vmem [resolvable:$true] %s1423_s9 }
   0xa   :  { %v113_v14 = vand.u32 4294901760, %v112_v11  ;;  %954 = vperm.xlu1 %1562, %v951_v51   ;;  %v1035_v57 = vand.u32 4294901760, %v963_v55  ;;  %s1563_s10 = scalar_lea.vmem %s1424_s9, 16  ;;  %s1567_s11 = scalar_lea.vmem %s1424_s9, 32 }
   0xb   :  { %v155_v15 = vsub.f32 %v153_v10, %v154_v13  ;;  %v570_v28 = vsub.f32 %v501_v20, %v569_v21  ;;  %p1564_p0 = scmp.ne.s32.totalorder %s1424_s9, %s1563_s10  ;;  %p1568_p1 = scmp.lt.s32.totalorder %s1424_s9, %s1424_s9 }
   0xc   :  { %496 = vperm.xlu0 %1561, %v493_v12   ;;  %v114_v16 = vsub.f32 %v112_v11, %v113_v14  ;;  %v1036_v63 = vsub.f32 %v963_v55, %v1035_v57  ;;  %p1569_p2 = scmp.lt.s32.totalorder %s1567_s11, %s1563_s10 }
   0xd   :  { %v156_v17 = vand.u32 4294901760, %v155_v15  ;;  %v571_v35 = vand.u32 4294901760, %v570_v28 }
   0xe   :  { %v115_v18 = vand.u32 4294901760, %v114_v16  ;;  %v1037_v7 = vand.u32 4294901760, %v1036_v63  ;;  %p1570_p3 = por %p1569_p2, %p1568_p1 }
   0xf   :  { %1473 = vmatpush3.msra.mxu1 %v156_v17  ;;  %v572_v42 = vsub.f32 %v570_v28, %v571_v35 }
  0x10   :  { %1470 = vmatmul.mubr.f32.vlgmr.msra.gmra.mxu0 %v115_v18  ;;  %1475 = vmatmul.mubr.f32.vlgmr.msra.gmra.mxu1 %v111_v8  ;;  %v1038_v12 = vsub.f32 %v1036_v63, %v1037_v7  ;;  %p1571_p4 = pnand %p1570_p3, %p1564_p0 }
  0x11   :  { %1478 = vmatpush3.msra.mxu0 %v153_v10  ;;  %1479 = vmatprep.mubr.msk.f32.mxu0 %vm1586_vm1, %v1585_v3  ;;  %v573_v45 = vand.u32 4294901760, %v572_v42 }
  0x12   :  { %1482 = vmatprep.subr.mxu1 %v1585_v3  ;;  %1484 = vmatprep.mubr.msk.f32.mxu1 %vm1586_vm1, %v1585_v3  ;;  %v1039_v16 = vand.u32 4294901760, %v1038_v12 }
  0x13   :  { %1483 = vmatpush3.msra.mxu1 %v76_v6  ;;  %1487 = vmatprep.subr.mxu0 %v1585_v3 }
  0x14   :  { %1480 = vmatmul.mubr.f32.vlgmr.msra.gmra.mxu0 %v112_v11  ;;  %1485 = vmatmul.mubr.f32.vlgmr.msra.gmra.mxu1 %v113_v14 }
  0x15   :  { %1488 = vmatpush3.msra.mxu0 %v154_v13  ;;  %1489 = vmatprep.mubr.msk.f32.mxu0 %vm1586_vm1, %v1585_v3 }
  0x16   :  { %1492 = vmatprep.subr.mxu1 %v1585_v3  ;;  %1494 = vmatprep.mubr.msk.f32.mxu1 %vm1586_vm1, %v1585_v3 }
  0x17   :  { %1493 = vmatpush3.msra.mxu1 %v76_v6  ;;  %1497 = vmatprep.subr.mxu0 %v1585_v3 }
  0x18   :  { %1490 = vmatmul.mubr.f32.vlgmr.msra.gmra.mxu0 %v111_v8  ;;  %1495 = vmatmul.mubr.f32.vlgmr.msra.gmra.mxu1 %v111_v8 }
  0x19   :  { %1499 = vmatprep.mubr.msk.f32.mxu0 %vm1586_vm1, %v1585_v3  ;;  %1502 = vmatprep.subr.mxu1 %v1585_v3 }
  0x1a   :  { %1504 = vmatprep.mubr.msk.f32.mxu1 %vm1586_vm1, %v1585_v3 }
  0x83   :  { %v35_v22 = vpop.permute.xlu0 %34 }
  0x87   :  { %v497_v58 = vpop.permute.xlu0 %496 }
  0xd0   :  { %v117_v23 = vpop.f32.mrf.mxu0  ;;  %v193_v24 = vpop.f32.mrf.mxu1 }
  0xd1   :  { %v118_v25 = vadd.f32 %v117_v23, %v35_v22  ;;  %v957_v22 = vlaneseq }
  0xd2   :  { %v1471_v26 = vpop.f32.mrf.mxu0  ;;  %v1476_v27 = vpop.f32.mrf.mxu1 }
  0xd3   :  { %v194_v29 = vadd.f32 %v193_v24, %v118_v25  ;;  %v958_v23 = vshrl.u32 %v957_v22, 7  ;;  %v955_v25 = vpop.permute.xlu1 %954 }
  0xd4   :  { %v267_v30 = vpop.f32.mrf.mxu0  ;;  %v341_v31 = vpop.f32.mrf.mxu1 }
  0xd5   :  { %v268_v32 = vadd.f32 %v267_v30, %v194_v29  ;;  %v959_v24 = vsub.s32 0, %v958_v23 }
  0xd6   :  { %v1481_v33 = vpop.f32.mrf.mxu0  ;;  %v1486_v34 = vpop.f32.mrf.mxu1 }
  0xd7   :  { %v342_v36 = vadd.f32 %v341_v31, %v268_v32  ;;  %v960_v27 = vrot.slane %v955_v25, %v959_v24 }
  0xd8   :  { %v415_v37 = vpop.f32.mrf.mxu0  ;;  %v487_v38 = vpop.f32.mrf.mxu1 }
  0xd9   :  { %v416_v39 = vadd.f32 %v415_v37, %v342_v36 }
  0xda   :  { %v1491_v40 = vpop.f32.mrf.mxu0  ;;  %v1496_v41 = vpop.f32.mrf.mxu1 }
  0xdb   :  { %v488_v43 = vadd.f32 %v487_v38, %v416_v39 }
  0xdd   :  { %v491_v44 = vmax.f32 %v488_v43, 0.0 }
  0xdf   :  { %v534_v46 = vand.u32 4294901760, %v491_v44 }
  0xe1   :  { %v611_v47 = vsub.f32 %v491_v44, %v534_v46  ;;  %1498 = vmatpush3.msra.mxu0 %v534_v46 }
  0xe2   :  { %1500 = vmatmul.mubr.f32.vlgmr.msra.gmra.mxu0 %v573_v45  ;;  %1507 = vmatprep.subr.mxu0 %v1585_v3 }
  0xe3   :  { %v612_v48 = vand.u32 4294901760, %v611_v47  ;;  %1508 = vmatpush3.msra.mxu0 %v611_v47  ;;  %1509 = vmatprep.mubr.msk.f32.mxu0 %vm1586_vm1, %v1585_v3 }
  0xe4   :  { %1517 = vmatprep.subr.mxu0 %v1585_v3 }
  0xe5   :  { %v613_v49 = vsub.f32 %v611_v47, %v612_v48 }
  0xe6   :  { %1510 = vmatmul.mubr.f32.vlgmr.msra.gmra.mxu0 %v570_v28 }
  0xe7   :  { %1518 = vmatpush3.msra.mxu0 %v612_v48  ;;  %v614_v50 = vand.u32 4294901760, %v613_v49  ;;  %1519 = vmatprep.mubr.msk.f32.mxu0 %vm1586_vm1, %v1585_v3 }
  0xe8   :  { %1527 = vmatprep.subr.mxu0 %v1585_v3 }
  0xe9   :  { %1503 = vmatpush3.msra.mxu1 %v614_v50 }
  0xea   :  { %1505 = vmatmul.mubr.f32.vlgmr.msra.gmra.mxu1 %v569_v21  ;;  %1512 = vmatprep.subr.mxu1 %v1585_v3 }
  0xeb   :  { %1513 = vmatpush3.msra.mxu1 %v534_v46  ;;  %1514 = vmatprep.mubr.msk.f32.mxu1 %vm1586_vm1, %v1585_v3 }
  0xec   :  { %1522 = vmatprep.subr.mxu1 %v1585_v3  ;;  %1520 = vmatmul.mubr.f32.vlgmr.msra.gmra.mxu0 %v569_v21 }
  0xed   :  { %1529 = vmatprep.mubr.msk.f32.mxu0 %vm1586_vm1, %v1585_v3 }
  0xee   :  { %1515 = vmatmul.mubr.f32.vlgmr.msra.gmra.mxu1 %v571_v35 }
  0xef   :  { %1523 = vmatpush3.msra.mxu1 %v534_v46  ;;  %1524 = vmatprep.mubr.msk.f32.mxu1 %vm1586_vm1, %v1585_v3 }
  0xf0   :  { %1532 = vmatprep.subr.mxu1 %v1585_v3 }
  0xf2   :  { %1525 = vmatmul.mubr.f32.vlgmr.msra.gmra.mxu1 %v569_v21 }
  0xf3   :  { %1534 = vmatprep.mubr.msk.f32.mxu1 %vm1586_vm1, %v1585_v3 }
 0x1a2   :  { %v575_v53 = vpop.f32.mrf.mxu0 }
 0x1a3   :  { %v576_v60 = vadd.f32 %v575_v53, %v497_v58 }
 0x1a4   :  { %v1501_v54 = vpop.f32.mrf.mxu0 }
 0x1a6   :  { %v725_v56 = vpop.f32.mrf.mxu0 }
 0x1a8   :  { %v1511_v59 = vpop.f32.mrf.mxu0 }
 0x1aa   :  { %v651_v61 = vpop.f32.mrf.mxu1 }
 0x1ab   :  { %v652_v62 = vadd.f32 %v651_v61, %v576_v60 }
 0x1ac   :  { %v1506_v0 = vpop.f32.mrf.mxu1  ;;  %v873_v1 = vpop.f32.mrf.mxu0 }
 0x1ad   :  { %v726_v2 = vadd.f32 %v725_v56, %v652_v62 }
 0x1ae   :  { %v799_v4 = vpop.f32.mrf.mxu1  ;;  %v1521_v5 = vpop.f32.mrf.mxu0 }
 0x1af   :  { %v800_v6 = vadd.f32 %v799_v4, %v726_v2 }
 0x1b0   :  { %v1516_v8 = vpop.f32.mrf.mxu1 }
 0x1b1   :  { %v874_v9 = vadd.f32 %v873_v1, %v800_v6 }
 0x1b2   :  { %v945_v10 = vpop.f32.mrf.mxu1 }
 0x1b3   :  { %v946_v11 = vadd.f32 %v945_v10, %v874_v9 }
 0x1b4   :  { %v1526_v13 = vpop.f32.mrf.mxu1 }
 0x1b5   :  { %v949_v14 = vmax.f32 %v946_v11, 0.0 }
 0x1b7   :  { %v967_v15 = vsel %vm965_vm5, %v949_v14, 0 }
 0x1b8   :  { %v1000_v17 = vand.u32 4294901760, %v967_v15 }
 0x1ba   :  { %v1077_v18 = vsub.f32 %v967_v15, %v1000_v17  ;;  %1528 = vmatpush3.msra.mxu0 %v1000_v17 }
 0x1bb   :  { %1530 = vmatmul.mubr.f32.vlgmr.msra.gmra.mxu0 %v1039_v16  ;;  %1537 = vmatprep.subr.mxu0 %v1585_v3 }
 0x1bc   :  { %1538 = vmatpush3.msra.mxu0 %v1077_v18  ;;  %1539 = vmatprep.mubr.msk.f32.mxu0 %vm1586_vm1, %v1585_v3  ;;  %v1078_v19 = vand.u32 4294901760, %v1077_v18 }
 0x1bd   :  { %1547 = vmatprep.subr.mxu0 %v1585_v3 }
 0x1be   :  { %v1079_v20 = vsub.f32 %v1077_v18, %v1078_v19 }
 0x1bf   :  { %1540 = vmatmul.mubr.f32.vlgmr.msra.gmra.mxu0 %v1036_v63 }
 0x1c0   :  { %1548 = vmatpush3.msra.mxu0 %v1078_v19  ;;  %v1080_v21 = vand.u32 4294901760, %v1079_v20  ;;  %1549 = vmatprep.mubr.msk.f32.mxu0 %vm1586_vm1, %v1585_v3 }
 0x1c2   :  { %1533 = vmatpush3.msra.mxu1 %v1080_v21 }
 0x1c3   :  { %1535 = vmatmul.mubr.f32.vlgmr.msra.gmra.mxu1 %v1035_v57  ;;  %1542 = vmatprep.subr.mxu1 %v1585_v3 }
 0x1c4   :  { %1543 = vmatpush3.msra.mxu1 %v1000_v17  ;;  %1544 = vmatprep.mubr.msk.f32.mxu1 %vm1586_vm1, %v1585_v3 }
 0x1c5   :  { %1552 = vmatprep.subr.mxu1 %v1585_v3  ;;  %1550 = vmatmul.mubr.f32.vlgmr.msra.gmra.mxu0 %v1035_v57 }
 0x1c7   :  { %1545 = vmatmul.mubr.f32.vlgmr.msra.gmra.mxu1 %v1037_v7 }
 0x1c8   :  { %1553 = vmatpush3.msra.mxu1 %v1000_v17  ;;  %1554 = vmatprep.mubr.msk.f32.mxu1 %vm1586_vm1, %v1585_v3 }
 0x1cb   :  { %1555 = vmatmul.mubr.f32.vlgmr.msra.gmra.mxu1 %v1035_v57 }
 0x27b   :  { %v1041_v26 = vpop.f32.mrf.mxu0 }
 0x27c   :  { %v1042_v30 = vadd.f32 %v1041_v26, %v960_v27 }
 0x27d   :  { %v1531_v28 = vpop.f32.mrf.mxu0 }
 0x27f   :  { %v1191_v29 = vpop.f32.mrf.mxu0 }
 0x281   :  { %v1541_v31 = vpop.f32.mrf.mxu0 }
 0x283   :  { %v1117_v32 = vpop.f32.mrf.mxu1 }
 0x284   :  { %v1118_v33 = vadd.f32 %v1117_v32, %v1042_v30 }
 0x285   :  { %v1536_v34 = vpop.f32.mrf.mxu1  ;;  %v1339_v35 = vpop.f32.mrf.mxu0 }
 0x286   :  { %v1192_v36 = vadd.f32 %v1191_v29, %v1118_v33 }
 0x287   :  { %v1265_v37 = vpop.f32.mrf.mxu1  ;;  %v1551_v38 = vpop.f32.mrf.mxu0 }
 0x288   :  { %v1266_v39 = vadd.f32 %v1265_v37, %v1192_v36 }
 0x289   :  { %v1546_v3 = vpop.f32.mrf.mxu1 }
 0x28a   :  { %v1340_v40 = vadd.f32 %v1339_v35, %v1266_v39 }
 0x28b   :  { %v1411_v41 = vpop.f32.mrf.mxu1 }
 0x28c   :  { %v1412_v42 = vadd.f32 %v1411_v41, %v1340_v40 }
 0x28d   :  { %v1556_v43 = vpop.f32.mrf.mxu1 }
 0x28e   :  { %v1415_v44 = vmax.f32 %v1412_v42, 0.0 }
 0x290   :  { %1416 = vst [vmem:[#allocation3] sm:$0x1] %v1415_v44 }
 0x291   :  { %1574 = shalt.err (!%p1571_p4)
}
 0x292   :  { %1426 = dma.vmem_to_hbm [thread:$0]  %s1424_s9, 16, %s1714_s7, [#allocation4]  }
 0x293   :  { %1583 = dma.done.wait [#allocation4], 16  }
 0x294   :  { %1584 = vsyncadd [#allocation4], 4294967280 }
 0x295   :  { %1430 = vsyncpa [#allocation4], 1 }

</bundles_post_ra>
